<compile_context>
chip_gen: v5e
topology: v5e:2x2
jax: 0.10.0
libtpu: 0.0.40
codegen_flags: <defaults>
</compile_context>

<pallas_src>
import functools
import math

import jax
import jax.numpy as jnp
from jax.experimental import pallas as pl
from jax.experimental.pallas import tpu as pltpu


def _round_up(x, m):
    return -(-x // m) * m


def _filter_factory_kernel(lb_ref, corr_ref, wcls_ref, whead_ref, sbias_ref,
                           bhead_ref, r_ref, p_ref, *, num_state, out_dim):
    S, O = num_state, out_dim

    # In-kernel cast to bf16 (inputs arrive as f32; no wrapper-side cast pass).
    lb = lb_ref[...].astype(jnp.bfloat16)
    corr = corr_ref[...].astype(jnp.bfloat16)

    # Classifier matmul + channel-dependent state bias; softmax in f32.
    logits = jnp.dot(lb, wcls_ref[...], preferred_element_type=jnp.float32)
    logits = logits + sbias_ref[...]
    m = jnp.max(logits, axis=-1, keepdims=True)
    e = jnp.exp(logits - m)
    p = e * pl.reciprocal(jnp.sum(e, axis=-1, keepdims=True), approx=True)
    p_ref[...] = p.astype(p_ref.dtype)

    # All S per-state head matmuls fused into one MXU matmul.
    y = jnp.dot(corr, whead_ref[...], preferred_element_type=jnp.float32)

    # p-weighted reduction over the S head blocks + per-state head bias.
    # (Per-state lane slices are not 128-aligned; acceptable, the kernel is
    #  HBM-bound, not XLU/VALU-bound.)
    bh = bhead_ref[...]                                   # (S, O) f32
    acc = p[:, 0:1] * (y[:, 0:O] + bh[0:1, :])
    for s in range(1, S):
        acc = acc + p[:, s:s + 1] * (y[:, s * O:(s + 1) * O] + bh[s:s + 1, :])
    r_ref[...] = acc.astype(r_ref.dtype)


def _choose_tile_batches(B, C, seq_len, feat_dim, num_state, out_dim,
                         r_dtype=jnp.bfloat16, max_rows=4096):
    """Pick TB (batches per row tile) + vmem_limit_bytes.

    Padding-aware (128-lane / 8|16-sublane) VMEM accounting, budget derived
    from the chip's real VMEM capacity (v7x: 64 MiB), and a grid-step count
    steered to be even (>=4 when the batch allows) so both v7x TensorCores
    get balanced row tiles."""
    S, F, O, L = num_state, feat_dim, out_dim, seq_len
    lane = lambda n: _round_up(n, 128)
    r_bytes = jnp.dtype(r_dtype).itemsize

    # Per-row VMEM bytes (lane-padded): double-buffered streams + f32 scratch.
    per_row = (2 * lane(L) * 4              # lookback tile (f32, 2 buffers)
               + 2 * lane(F) * 4            # corr tile     (f32, 2 buffers)
               + 2 * lane(O) * r_bytes      # r out tile    (2 buffers)
               + 2 * lane(S) * 4            # p out tile    (f32, 2 buffers)
               + lane(S) * 4                # resident state-bias block
               + lane(S * O) * 4            # fused head-matmul result (f32)
               + lane(O) * 4                # weighted accumulator (f32)
               + 4 * lane(S) * 4)           # logits / exp / p / reduce temps

    # Resident (grid-invariant) blocks; count 2 buffers to stay conservative.
    resident = (2 * _round_up(L, 16) * lane(S) * 2          # classifier w, bf16
                + 2 * _round_up(F, 16) * lane(S * O) * 2    # fused head w, bf16
                + 2 * _round_up(S, 8) * lane(O) * 4)        # head bias, f32

    try:
        physical = int(pltpu.get_tpu_info().vmem_capacity_bytes)
    except Exception:
        physical = 64 * 1024 * 1024      # assume smallest (v7x per-TC VMEM)
    budget = int(physical * 0.45)        # ~29 MiB on v7x, ~58 MiB on v5e/v6e

    step = 16 // math.gcd(C, 16)         # smallest TB with TB*C % 16 == 0
    rows_cap = max(step * C, (budget - resident) // per_row)
    rows_cap = min(rows_cap, max_rows)
    tb_cap = max(step, (rows_cap // C) // step * step)

    # Largest useful tile first, then steer toward an even step count.
    tb = min(tb_cap, _round_up(B, step))
    if B > step:
        targets = [4, 6, 8, 12, 16, 2] if B >= 4 * step else [2, 4]
        for g in targets:
            cand = _round_up(-(-B // g), step)
            if step <= cand <= tb_cap and (-(-B // cand)) % 2 == 0:
                tb = cand
                break
        # best effort: nudge the tile down if the step count came out odd
        g = -(-B // tb)
        while g > 1 and g % 2 == 1 and tb - step >= step:
            tb -= step
            g = -(-B // tb)

    est = resident + tb * C * per_row
    vmem_limit = min(int(physical * 0.75),
                     max(32 * 1024 * 1024, int(est * 1.3)))
    return tb, vmem_limit


def filter_factory_forward(lookback_seq, corr_feat, params, *, feat_dim,
                           seq_len, num_state, out_dim,
                           out_dtype=jnp.bfloat16):
    """Forward of FilterFactory (num_state > 1, need_classifier=True)."""
    B, C, L = lookback_seq.shape
    assert L == seq_len
    assert corr_feat.shape == (B, C, feat_dim)
    S, F, O = num_state, feat_dim, out_dim
    N = B * C

    TB, vmem_limit = _choose_tile_batches(B, C, L, F, S, O, out_dtype)
    TN = TB * C
    grid = (pl.cdiv(B, TB),)   # ragged last block handles the B remainder

    # Free reshapes of the f32 inputs; cast to bf16 happens inside the kernel
    # (avoids a separate concat/cast/pad pass over the inputs).
    lb = lookback_seq.reshape(N, L)
    corr = corr_feat.reshape(N, F)

    # Resident packed weights (tiny; cast once).
    wcls = params["classifier_w"].T.astype(jnp.bfloat16)                  # (L, S)
    whead = (params["mix_head_w"].reshape(S, F, O)
             .transpose(1, 0, 2).reshape(F, S * O)).astype(jnp.bfloat16)  # (F, S*O)
    bhead = params["mix_head_b"].astype(jnp.float32)                      # (S, O)

    # Channel-dependent state bias for ONE row tile (rows cycle through the C
    # channels; TN is a multiple of C and every block starts at a multiple of
    # C, so the pattern lines up for every tile, including the ragged one).
    sbias = jnp.tile(params["bias"][None, :] + params["basic_state"],
                     (TB, 1)).astype(jnp.float32)                         # (TN, S)

    kernel = functools.partial(_filter_factory_kernel, num_state=S, out_dim=O)

    # Note: p stays a narrow (N, S) f32 output (32 B/row); lane-dense packing
    # of p is only worth it if store-slot pressure shows up after the r/bf16
    # change.
    r_flat, p_flat = pl.pallas_call(
        kernel,
        out_shape=(jax.ShapeDtypeStruct((N, O), out_dtype),
                   jax.ShapeDtypeStruct((N, S), jnp.float32)),
        grid_spec=pltpu.PrefetchScalarGridSpec(
            num_scalar_prefetch=0,
            grid=grid,
            in_specs=[
                pl.BlockSpec((TN, L), lambda i: (i, 0)),         # lookback tile
                pl.BlockSpec((TN, F), lambda i: (i, 0)),         # corr tile
                pl.BlockSpec((L, S), lambda i: (0, 0)),          # classifier w
                pl.BlockSpec((F, S * O), lambda i: (0, 0)),      # fused head w
                pl.BlockSpec((TN, S), lambda i: (0, 0)),         # state bias
                pl.BlockSpec((S, O), lambda i: (0, 0)),          # head bias
            ],
            out_specs=(
                pl.BlockSpec((TN, O), lambda i: (i, 0)),
                pl.BlockSpec((TN, S), lambda i: (i, 0)),
            ),
        ),
        compiler_params=pltpu.CompilerParams(
            dimension_semantics=("parallel",),
            vmem_limit_bytes=vmem_limit),
    )(lb, corr, wcls, whead, sbias, bhead)

    r = r_flat.reshape(B, C, O)
    p = p_flat.reshape(B, C, 1, S)   # matches torch's unsqueeze(-2)
    return r, p


def init_params(key, *, feat_dim, seq_len, num_channel, num_state, out_dim):
    """Deterministic init mirroring FilterFactory.__init__ parameter shapes."""
    k = jax.random.split(key, 5)
    S, F, O, C, L = num_state, feat_dim, out_dim, num_channel, seq_len
    bound_cls = 1.0 / math.sqrt(L)
    bound_state = 1.0 / math.sqrt(S)
    bound_head = 1.0 / math.sqrt(F)
    classifier_w = jax.random.uniform(k[0], (S, L), jnp.float32,
                                      -bound_cls, bound_cls)
    basic_state = jax.random.uniform(k[1], (C, S), jnp.float32,
                                     -bound_state, bound_state)
    bias = jax.random.uniform(k[2], (S,), jnp.float32, -bound_cls, bound_cls)
    # nn.Linear(feat_dim, out_dim*num_state) -> weight (O*S, F), bias (O*S,)
    tmp_w = jax.random.uniform(k[3], (O * S, F), jnp.float32,
                               -bound_head, bound_head)
    tmp_b = jax.random.uniform(k[4], (O * S,), jnp.float32,
                               -bound_head, bound_head)
    mix_head_w = tmp_w.reshape(O, S, F).transpose(1, 2, 0).reshape(S, F * O)
    mix_head_b = tmp_b.reshape(O, S).T
    return dict(classifier_w=classifier_w, basic_state=basic_state, bias=bias,
                mix_head_w=mix_head_w, mix_head_b=mix_head_b)


def _reference(lookback_seq, corr_feat, params, *, feat_dim, num_state, out_dim):
    """Pure-JAX reference following the torch FilterFactory forward."""
    S, F, O = num_state, feat_dim, out_dim
    logits = (params["bias"] + params["basic_state"][None]
              + jnp.einsum("bcl,sl->bcs", lookback_seq, params["classifier_w"]))
    p = jax.nn.softmax(logits, axis=-1)
    W = params["mix_head_w"].reshape(S, F, O)
    weight = jnp.einsum("bcs,sfo->bcfo", p, W)
    bias = jnp.einsum("bcs,so->bco", p, params["mix_head_b"])
    r = jnp.einsum("bcf,bcfo->bco", corr_feat, weight) + bias
    return r, p[:, :, None, :]


if __name__ == "__main__":
    # Shapes consistent with LeadRefiner.factory:
    #   feat_dim = K, out_dim = (pred_len // 2 + 1) * (2K + 1), state_num = 8
    B, C = 6, 4                                   # B=6 exercises the ragged last block
    seq_len, pred_len, K, num_state = 32, 16, 8, 8
    feat_dim = K
    out_dim = (pred_len // 2 + 1) * (2 * K + 1)   # 9 * 17 = 153

    key = jax.random.PRNGKey(0)
    kp, kx, ky = jax.random.split(key, 3)
    params = init_params(kp, feat_dim=feat_dim, seq_len=seq_len,
                         num_channel=C, num_state=num_state, out_dim=out_dim)

    lookback_seq = jax.random.normal(kx, (B, C, seq_len), jnp.float32)
    corr_feat = jax.random.normal(ky, (B, C, feat_dim), jnp.float32)

    r, p = filter_factory_forward(lookback_seq, corr_feat, params,
                                  feat_dim=feat_dim, seq_len=seq_len,
                                  num_state=num_state, out_dim=out_dim)
    jax.block_until_ready((r, p))

    # Reference computed on the same bf16-rounded inputs / matmul weights that
    # feed the MXU; head bias / state bias stay f32 (as in the kernel).
    def bf16(x):
        return x.astype(jnp.bfloat16).astype(jnp.float32)

    ref_params = dict(params)
    for name in ("classifier_w", "mix_head_w"):
        ref_params[name] = bf16(params[name])
    r_ref, p_ref = _reference(bf16(lookback_seq), bf16(corr_feat), ref_params,
                              feat_dim=feat_dim, num_state=num_state,
                              out_dim=out_dim)

    assert r.shape == (B, C, out_dim) and p.shape == (B, C, 1, num_state)
    assert r.dtype == jnp.bfloat16
    # r is bf16 (output-traffic optimization) -> bf16-level tolerance;
    # p is f32 with approx-reciprocal softmax -> modest tolerance.
    assert jnp.allclose(r.astype(jnp.float32), r_ref,
                        atol=3e-2, rtol=3e-2), "r mismatch"
    assert jnp.allclose(p, p_ref, atol=5e-3, rtol=5e-3), "p mismatch"
    print("KERNEL_OK")
</pallas_src>

<mosaic_0001>
module attributes {stable_mosaic.version = 11 : i64} {
  func.func @_filter_factory_kernel(%arg0: i32, %arg1: memref<16x32xf32, #tpu.memory_space<vmem>>, %arg2: memref<16x8xf32, #tpu.memory_space<vmem>>, %arg3: memref<32x8xbf16, #tpu.memory_space<vmem>>, %arg4: memref<8x1224xbf16, #tpu.memory_space<vmem>>, %arg5: memref<16x8xf32, #tpu.memory_space<vmem>>, %arg6: memref<8x153xf32, #tpu.memory_space<vmem>>, %arg7: memref<16x153xbf16, #tpu.memory_space<vmem>>, %arg8: memref<16x8xf32, #tpu.memory_space<vmem>>) attributes {dimension_semantics = [#tpu.dimension_semantics<parallel>], iteration_bounds = array<i64: 2>, scalar_prefetch = 0 : i64, scratch_operands = 0 : i64, tpu.core_type = #tpu.core_type<tc>, window_params = [{transform_indices = @transform_0, window_bounds = array<i64: 16, 32>}, {transform_indices = @transform_1, window_bounds = array<i64: 16, 8>}, {pipeline_mode = #tpu.pipeline_mode<synchronous>, transform_indices = @transform_2, window_bounds = array<i64: 32, 8>}, {pipeline_mode = #tpu.pipeline_mode<synchronous>, transform_indices = @transform_3, window_bounds = array<i64: 8, 1224>}, {pipeline_mode = #tpu.pipeline_mode<synchronous>, transform_indices = @transform_4, window_bounds = array<i64: 16, 8>}, {pipeline_mode = #tpu.pipeline_mode<synchronous>, transform_indices = @transform_5, window_bounds = array<i64: 8, 153>}, {transform_indices = @transform_6, window_bounds = array<i64: 16, 153>}, {transform_indices = @transform_7, window_bounds = array<i64: 16, 8>}]} {
    %c0 = arith.constant 0 : index
    %c0_0 = arith.constant 0 : index
    %0 = vector.load %arg1[%c0, %c0_0] : memref<16x32xf32, #tpu.memory_space<vmem>>, vector<16x32xf32>
    %1 = arith.truncf %0 : vector<16x32xf32> to vector<16x32xbf16>
    %c0_1 = arith.constant 0 : index
    %c0_2 = arith.constant 0 : index
    %2 = vector.load %arg2[%c0_1, %c0_2] : memref<16x8xf32, #tpu.memory_space<vmem>>, vector<16x8xf32>
    %3 = arith.truncf %2 : vector<16x8xf32> to vector<16x8xbf16>
    %c0_3 = arith.constant 0 : index
    %c0_4 = arith.constant 0 : index
    %4 = vector.load %arg3[%c0_3, %c0_4] : memref<32x8xbf16, #tpu.memory_space<vmem>>, vector<32x8xbf16>
    %cst = arith.constant dense<0.000000e+00> : vector<16x8xf32>
    %5 = tpu.matmul %1, %4, %cst {dimension_numbers = #tpu.dot_dimension_numbers<[1], [0], [0], [1], [0, 0, 1, 1], [], []>} : vector<16x32xbf16>, vector<32x8xbf16>, vector<16x8xf32> -> vector<16x8xf32>
    %c0_5 = arith.constant 0 : index
    %c0_6 = arith.constant 0 : index
    %6 = vector.load %arg5[%c0_5, %c0_6] : memref<16x8xf32, #tpu.memory_space<vmem>>, vector<16x8xf32>
    %7 = arith.addf %5, %6 : vector<16x8xf32>
    %cst_7 = arith.constant dense<0xFF800000> : vector<16xf32>
    %8 = vector.multi_reduction <maximumf>, %7, %cst_7 [1] : vector<16x8xf32> to vector<16xf32>
    %9 = vector.shape_cast %8 : vector<16xf32> to vector<16x1xf32>
    %10 = vector.broadcast %9 : vector<16x1xf32> to vector<16x8xf32>
    %11 = arith.subf %7, %10 : vector<16x8xf32>
    %12 = math.exp %11 : vector<16x8xf32>
    %cst_8 = arith.constant dense<0.000000e+00> : vector<16xf32>
    %13 = vector.multi_reduction <add>, %12, %cst_8 [1] : vector<16x8xf32> to vector<16xf32>
    %14 = vector.shape_cast %13 : vector<16xf32> to vector<16x1xf32>
    %15 = tpu.reciprocal %14 {approx = true} : vector<16x1xf32> -> vector<16x1xf32>
    %16 = vector.broadcast %15 : vector<16x1xf32> to vector<16x8xf32>
    %17 = arith.mulf %12, %16 : vector<16x8xf32>
    %c0_9 = arith.constant 0 : index
    %c0_10 = arith.constant 0 : index
    %18 = vector.load %arg8[%c0_9, %c0_10] : memref<16x8xf32, #tpu.memory_space<vmem>>, vector<16x8xf32>
    tpu.vector_store %arg8[%c0_9, %c0_10], %17 {strides = array<i32>} : memref<16x8xf32, #tpu.memory_space<vmem>>, vector<16x8xf32>,
    %c0_11 = arith.constant 0 : index
    %c0_12 = arith.constant 0 : index
    %19 = vector.load %arg4[%c0_11, %c0_12] : memref<8x1224xbf16, #tpu.memory_space<vmem>>, vector<8x1224xbf16>
    %cst_13 = arith.constant dense<0.000000e+00> : vector<16x1224xf32>
    %20 = tpu.matmul %3, %19, %cst_13 {dimension_numbers = #tpu.dot_dimension_numbers<[1], [0], [0], [1], [0, 0, 1, 1], [], []>} : vector<16x8xbf16>, vector<8x1224xbf16>, vector<16x1224xf32> -> vector<16x1224xf32>
    %c0_14 = arith.constant 0 : index
    %c0_15 = arith.constant 0 : index
    %21 = vector.load %arg6[%c0_14, %c0_15] : memref<8x153xf32, #tpu.memory_space<vmem>>, vector<8x153xf32>
    %22 = vector.extract_strided_slice %17 {offsets = [0, 0], sizes = [16, 1], strides = [1, 1]} : vector<16x8xf32> to vector<16x1xf32>
    %23 = vector.extract_strided_slice %20 {offsets = [0, 0], sizes = [16, 153], strides = [1, 1]} : vector<16x1224xf32> to vector<16x153xf32>
    %24 = vector.extract_strided_slice %21 {offsets = [0, 0], sizes = [1, 153], strides = [1, 1]} : vector<8x153xf32> to vector<1x153xf32>
    %25 = vector.broadcast %24 : vector<1x153xf32> to vector<16x153xf32>
    %26 = arith.addf %23, %25 : vector<16x153xf32>
    %27 = vector.broadcast %22 : vector<16x1xf32> to vector<16x153xf32>
    %28 = arith.mulf %27, %26 : vector<16x153xf32>
    %29 = vector.extract_strided_slice %17 {offsets = [0, 1], sizes = [16, 1], strides = [1, 1]} : vector<16x8xf32> to vector<16x1xf32>
    %30 = vector.extract_strided_slice %20 {offsets = [0, 153], sizes = [16, 153], strides = [1, 1]} : vector<16x1224xf32> to vector<16x153xf32>
    %31 = vector.extract_strided_slice %21 {offsets = [1, 0], sizes = [1, 153], strides = [1, 1]} : vector<8x153xf32> to vector<1x153xf32>
    %32 = vector.broadcast %31 : vector<1x153xf32> to vector<16x153xf32>
    %33 = arith.addf %30, %32 : vector<16x153xf32>
    %34 = vector.broadcast %29 : vector<16x1xf32> to vector<16x153xf32>
    %35 = arith.mulf %34, %33 : vector<16x153xf32>
    %36 = arith.addf %28, %35 : vector<16x153xf32>
    %37 = vector.extract_strided_slice %17 {offsets = [0, 2], sizes = [16, 1], strides = [1, 1]} : vector<16x8xf32> to vector<16x1xf32>
    %38 = vector.extract_strided_slice %20 {offsets = [0, 306], sizes = [16, 153], strides = [1, 1]} : vector<16x1224xf32> to vector<16x153xf32>
    %39 = vector.extract_strided_slice %21 {offsets = [2, 0], sizes = [1, 153], strides = [1, 1]} : vector<8x153xf32> to vector<1x153xf32>
    %40 = vector.broadcast %39 : vector<1x153xf32> to vector<16x153xf32>
    %41 = arith.addf %38, %40 : vector<16x153xf32>
    %42 = vector.broadcast %37 : vector<16x1xf32> to vector<16x153xf32>
    %43 = arith.mulf %42, %41 : vector<16x153xf32>
    %44 = arith.addf %36, %43 : vector<16x153xf32>
    %45 = vector.extract_strided_slice %17 {offsets = [0, 3], sizes = [16, 1], strides = [1, 1]} : vector<16x8xf32> to vector<16x1xf32>
    %46 = vector.extract_strided_slice %20 {offsets = [0, 459], sizes = [16, 153], strides = [1, 1]} : vector<16x1224xf32> to vector<16x153xf32>
    %47 = vector.extract_strided_slice %21 {offsets = [3, 0], sizes = [1, 153], strides = [1, 1]} : vector<8x153xf32> to vector<1x153xf32>
    %48 = vector.broadcast %47 : vector<1x153xf32> to vector<16x153xf32>
    %49 = arith.addf %46, %48 : vector<16x153xf32>
    %50 = vector.broadcast %45 : vector<16x1xf32> to vector<16x153xf32>
    %51 = arith.mulf %50, %49 : vector<16x153xf32>
    %52 = arith.addf %44, %51 : vector<16x153xf32>
    %53 = vector.extract_strided_slice %17 {offsets = [0, 4], sizes = [16, 1], strides = [1, 1]} : vector<16x8xf32> to vector<16x1xf32>
    %54 = vector.extract_strided_slice %20 {offsets = [0, 612], sizes = [16, 153], strides = [1, 1]} : vector<16x1224xf32> to vector<16x153xf32>
    %55 = vector.extract_strided_slice %21 {offsets = [4, 0], sizes = [1, 153], strides = [1, 1]} : vector<8x153xf32> to vector<1x153xf32>
    %56 = vector.broadcast %55 : vector<1x153xf32> to vector<16x153xf32>
    %57 = arith.addf %54, %56 : vector<16x153xf32>
    %58 = vector.broadcast %53 : vector<16x1xf32> to vector<16x153xf32>
    %59 = arith.mulf %58, %57 : vector<16x153xf32>
    %60 = arith.addf %52, %59 : vector<16x153xf32>
    %61 = vector.extract_strided_slice %17 {offsets = [0, 5], sizes = [16, 1], strides = [1, 1]} : vector<16x8xf32> to vector<16x1xf32>
    %62 = vector.extract_strided_slice %20 {offsets = [0, 765], sizes = [16, 153], strides = [1, 1]} : vector<16x1224xf32> to vector<16x153xf32>
    %63 = vector.extract_strided_slice %21 {offsets = [5, 0], sizes = [1, 153], strides = [1, 1]} : vector<8x153xf32> to vector<1x153xf32>
    %64 = vector.broadcast %63 : vector<1x153xf32> to vector<16x153xf32>
    %65 = arith.addf %62, %64 : vector<16x153xf32>
    %66 = vector.broadcast %61 : vector<16x1xf32> to vector<16x153xf32>
    %67 = arith.mulf %66, %65 : vector<16x153xf32>
    %68 = arith.addf %60, %67 : vector<16x153xf32>
    %69 = vector.extract_strided_slice %17 {offsets = [0, 6], sizes = [16, 1], strides = [1, 1]} : vector<16x8xf32> to vector<16x1xf32>
    %70 = vector.extract_strided_slice %20 {offsets = [0, 918], sizes = [16, 153], strides = [1, 1]} : vector<16x1224xf32> to vector<16x153xf32>
    %71 = vector.extract_strided_slice %21 {offsets = [6, 0], sizes = [1, 153], strides = [1, 1]} : vector<8x153xf32> to vector<1x153xf32>
    %72 = vector.broadcast %71 : vector<1x153xf32> to vector<16x153xf32>
    %73 = arith.addf %70, %72 : vector<16x153xf32>
    %74 = vector.broadcast %69 : vector<16x1xf32> to vector<16x153xf32>
    %75 = arith.mulf %74, %73 : vector<16x153xf32>
    %76 = arith.addf %68, %75 : vector<16x153xf32>
    %77 = vector.extract_strided_slice %17 {offsets = [0, 7], sizes = [16, 1], strides = [1, 1]} : vector<16x8xf32> to vector<16x1xf32>
    %78 = vector.extract_strided_slice %20 {offsets = [0, 1071], sizes = [16, 153], strides = [1, 1]} : vector<16x1224xf32> to vector<16x153xf32>
    %79 = vector.extract_strided_slice %21 {offsets = [7, 0], sizes = [1, 153], strides = [1, 1]} : vector<8x153xf32> to vector<1x153xf32>
    %80 = vector.broadcast %79 : vector<1x153xf32> to vector<16x153xf32>
    %81 = arith.addf %78, %80 : vector<16x153xf32>
    %82 = vector.broadcast %77 : vector<16x1xf32> to vector<16x153xf32>
    %83 = arith.mulf %82, %81 : vector<16x153xf32>
    %84 = arith.addf %76, %83 : vector<16x153xf32>
    %85 = arith.truncf %84 : vector<16x153xf32> to vector<16x153xbf16>
    %c0_16 = arith.constant 0 : index
    %c0_17 = arith.constant 0 : index
    %86 = vector.load %arg7[%c0_16, %c0_17] : memref<16x153xbf16, #tpu.memory_space<vmem>>, vector<16x153xbf16>
    tpu.vector_store %arg7[%c0_16, %c0_17], %85 {strides = array<i32>} : memref<16x153xbf16, #tpu.memory_space<vmem>>, vector<16x153xbf16>,
    return
  }
  func.func @transform_0(%arg0: i32) -> (i32, i32) {
    %c0_i32 = arith.constant 0 : i32
    %c0_i32_0 = arith.constant 0 : i32
    return %arg0, %c0_i32 : i32, i32
  }
  func.func @transform_1(%arg0: i32) -> (i32, i32) {
    %c0_i32 = arith.constant 0 : i32
    %c0_i32_0 = arith.constant 0 : i32
    return %arg0, %c0_i32 : i32, i32
  }
  func.func @transform_2(%arg0: i32) -> (i32, i32) {
    %c0_i32 = arith.constant 0 : i32
    %c0_i32_0 = arith.constant 0 : i32
    %c0_i32_1 = arith.constant 0 : i32
    return %c0_i32, %c0_i32_0 : i32, i32
  }
  func.func @transform_3(%arg0: i32) -> (i32, i32) {
    %c0_i32 = arith.constant 0 : i32
    %c0_i32_0 = arith.constant 0 : i32
    %c0_i32_1 = arith.constant 0 : i32
    return %c0_i32, %c0_i32_0 : i32, i32
  }
  func.func @transform_4(%arg0: i32) -> (i32, i32) {
    %c0_i32 = arith.constant 0 : i32
    %c0_i32_0 = arith.constant 0 : i32
    %c0_i32_1 = arith.constant 0 : i32
    return %c0_i32, %c0_i32_0 : i32, i32
  }
  func.func @transform_5(%arg0: i32) -> (i32, i32) {
    %c0_i32 = arith.constant 0 : i32
    %c0_i32_0 = arith.constant 0 : i32
    %c0_i32_1 = arith.constant 0 : i32
    return %c0_i32, %c0_i32_0 : i32, i32
  }
  func.func @transform_6(%arg0: i32) -> (i32, i32) {
    %c0_i32 = arith.constant 0 : i32
    %c0_i32_0 = arith.constant 0 : i32
    return %arg0, %c0_i32 : i32, i32
  }
  func.func @transform_7(%arg0: i32) -> (i32, i32) {
    %c0_i32 = arith.constant 0 : i32
    %c0_i32_0 = arith.constant 0 : i32
    return %arg0, %c0_i32 : i32, i32
  }
}

</mosaic_0001>

<bundles_post_ra>
// kernel: tpu_custom_call.1
= control target key start
LH: loop header
LB: loop body
LE: loop exit
PB: predicated region body
PF: predicated region fallthrough
CT: control target
= control target key end

     0   :  { %s2300_s0 = inlined_call_operand.hbm [shape: f32[24,32], index: 0, kind: input, shape index: {}]   ;;  %s2301_s1 = inlined_call_operand.vmem [shape: f32[24,8], index: 1, kind: input, shape index: {}]   ;;  %s2302_s2 = inlined_call_operand.vmem [shape: bf16[32,8], index: 2, kind: input, shape index: {}]   ;;  %s2303_s3 = inlined_call_operand.vmem [shape: bf16[8,1224], index: 3, kind: input, shape index: {}]   ;;  %s2304_s4 = inlined_call_operand.vmem [shape: f32[16,8], index: 4, kind: input, shape index: {}]   ;;  %s2305_s5 = inlined_call_operand.vmem [shape: f32[8,153], index: 5, kind: input, shape index: {}]   ;;  %s2306_s6 = inlined_call_operand.hbm [shape: bf16[24,153], index: 6, kind: output, shape index: {0}]   ;;  %s2307_s7 = inlined_call_operand.vmem [shape: f32[24,8], index: 7, kind: output, shape index: {1}]  }
   0x1   :  { %2313 = sst [smem:[#allocation11_spill]] %s2300_s0 }
   0x2   :  { %2314 = sst [smem:[#allocation12_spill]] %s2301_s1 }
   0x3   :  { %13 = vsyncpa [#allocation3], 0 }
   0x4   :  { %15 = vsyncpa [#allocation3 + $0x1], 0 }
   0x5   :  { %16 = vsyncpa [#allocation4], 0 }
   0x6   :  { %18 = vsyncpa [#allocation4 + $0x1], 0  ;;  %s1822_s24 = smov 0   ;;  %s1824_s25 = smov 0  }
   0x7   :  { %s1826_s26 = smov 0   ;;  %s1828_s27 = smov 0  }
   0x8 LB: > { %2315 = sst [smem:[#allocation9_spill]] %s1716_s26  ;;  %s1843_s28 = sadd.s32 4294967295, %s1720_s27   ;;  %s1720_s27 = sphi %s1828_s27, %s2335_s27   ;;  %s1716_s26 = sphi %s1826_s26, %s2334_s26   ;;  %s1712_s25 = sphi %s1824_s25, %s2333_s25   ;;  %s1708_s24 = sphi %s1822_s24, %s2332_s24  }
   0x9   : > { %s1348_s29 = sadd.s32 4294967294, %s1720_s27   ;;  %s1847_s30 = sadd.s32 1, %s1720_s27  }
   0xa   : > { %s31_s8 = sadd.s32 1, %s1716_s26  ;;  %s28_s9 = ssub.s32 %s1720_s27, %s1847_s30 }
   0xb   : > { %p38_p0 = scmp.ne.s32.totalorder %s1716_s26, %s1712_s25  ;;  %p29_p1 = scmp.eq.s32.totalorder %s28_s9, 0 }
   0xc   : > { %p39_p2 = scmp.eq.s32.totalorder %s1720_s27, 0  ;;  %p44_p3 = scmp.ne.s32.totalorder %s1712_s25, %s1708_s24 }
   0xd   : > { %p45_p4 = scmp.eq.s32.totalorder %s1843_s28, 0  ;;  %p178_p7 = scmp.eq.s32.totalorder %s1843_s28, 1 }
   0xe   : > { %s1859_s10 = scalar_select %p29_p1, %s1716_s26, %s31_s8  }
   0xf   : > { %p40_p5 = por %p39_p2, %p38_p0  ;;  %p1861_p6 = por %p45_p4, %p44_p3 }
  0x10   : > { %2316 = sst [smem:[#allocation10_spill]] %s1859_s10  ;;  %p184_p8 = scmp.eq.s32.totalorder %s1348_s29, 1 }
  0x11   : > { %p1866_p9 = por %p178_p7, %p38_p0  ;;  %p2310_p11 = scmp.ge.s32.totalorder %s1720_s27, 2 }
  0x12   : > { %p1870_p10 = por %p184_p8, %p44_p3 }
  0x13   : > { %238 = sbr.rel (%p2310_p11) target bundleno = 67 (0x43), region = 32 }
  0x18   : > { %241 = sbr.rel (!%p40_p5) target bundleno = 67 (0x43), region = 36  ;;  %s242_s14 = sand.u32 (%p40_p5), 1, %s1716_s26  }
  0x19   : > { %s1352_s15 = sshll.u32 (%p40_p5), %s1720_s27, 1  ;;  %s1351_s16 = sshll.u32 (%p40_p5), %s242_s14, 4 }
  0x1a   : > { %s248_s17 = ssub.s32 (%p40_p5), 3, %s1352_s15  ;;  %s1882_s21 = scalar_lea.sflag (%p40_p5), [#allocation3], %s242_s14 }
  0x1b   : > { %p249_p12 = scmp.lt.s32.totalorder (%p40_p5), %s248_s17, 2  ;;  %s246_s22 = scalar_lea.vmem (%p40_p5), [#allocation2], %s1351_s16 }
  0x1d   : > { %s2337_s17 = smov (!%p249_p12, %s248_s17), 2 }
  0x1e   : > { %s1353_s18 = sshll.u32 %s2337_s17, 3 }
  0x1f   : > { %s252_s19 = ssub.s32 16, %s1353_s18 }
  0x20   : > { %s253_s20 = sshll.u32 %s252_s19, 4 }
  0x21   : > { %254 = vsyncadd %s1882_s21, %s253_s20  ;;  %p1885_p13 = scmp.ne.s32.totalorder %s1353_s18, 0  ;;  %s1409_s29 = sshll.u32 %s1720_s27, 4 }
  0x22   : > { %s2321_s0 = sld [smem:[#allocation11_spill]]  ;;  %s1893_s10 = sshll.u32 %s246_s22, 4  ;;  %s262_s10 = int_to_ptr.vmem [resolvable:$true] %s1893_s10 }
  0x23   : > { %s2308_s16 = sshll.u32 %s2337_s17, 7 }
  0x24   : > { %s1574_s18 = sshrl.u32 %s2308_s16, 4 }
  0x28   : > { %s257_s15 = scalar_lea.hbm %s2321_s0, %s1409_s29  ;;  %s1583_s22 = scalar_lea.hbm %s2321_s0, 24 }
  0x29   : > { %s259_s14 = sshll.u32 %s257_s15, 4  ;;  %s1896_s14 = int_to_ptr.hbm [resolvable:$true] %s259_s14 }
  0x2a   : > { %s1572_s19 = sshra.s32 %s1896_s14, 4  ;;  %s1573_s19 = int_to_ptr.hbm [resolvable:$true] %s1572_s19 }
  0x2b   : > { %s1579_s20 = scalar_lea.hbm %s1573_s19, %s1574_s18  ;;  %p1584_p3 = scmp.lt.s32.totalorder %s1573_s19, %s2321_s0 }
  0x2c   : > { %p1580_p0 = scmp.ne.s32.totalorder %s1573_s19, %s1579_s20  ;;  %p1585_p4 = scmp.lt.s32.totalorder %s1583_s22, %s1579_s20 }
  0x2e   : > { %p1581_p1 = pnand %p1580_p0, %p1885_p13  ;;  %p1586_p5 = por %p1585_p4, %p1584_p3 }
  0x30   : > { %p1582_p2 = pneg %p1581_p1 }
  0x32   : > { %p1587_p7 = pnand %p1586_p5, %p1582_p2 }
  0x34   : > { %1590 = shalt.err (!%p1587_p7)
}
  0x35   : > { %s1591_s16 = sshra.s32 %s262_s10, 4  ;;  %s1754_s8 = smov [#allocation2]   ;;  %s1592_s16 = int_to_ptr.vmem [resolvable:$true] %s1591_s16 }
  0x36   : > { %s1598_s26 = scalar_lea.vmem %s1592_s16, %s1574_s18  ;;  %s1602_s29 = scalar_lea.vmem %s1754_s8, 32 }
  0x37   : > { %p1599_p8 = scmp.ne.s32.totalorder %s1592_s16, %s1598_s26  ;;  %p1604_p1 = scmp.lt.s32.totalorder %s1602_s29, %s1598_s26 }
  0x39   : > { %p1600_p12 = pnand %p1599_p8, %p1885_p13 }
  0x3b   : > { %p1601_p0 = pneg %p1600_p12 }
  0x3d   : > { %p1606_p11 = pnand %p1604_p1, %p1601_p0 }
  0x3f   : > { %1609 = shalt.err (!%p1606_p11)
}
  0x40   : > { %s1755_s19 = smov 128   ;;  %s1756_s20 = smov 8  }
  0x41   : > { %s2322_s22 = sshll.u32 %s2337_s17, 7 }
  0x42   : > { %267 = dma.hbm_to_vmem [thread:$0]  (%p1885_p13), %s1896_s14, %s2322_s22, %s262_s10, %s1882_s21, %s1755_s19, %s1755_s19, %s1756_s20  }
  0x43 PF: > { %p1358_p2 = scmp.ge.s32.totalorder %s1720_s27, 1  ;;  %p286_p3 = scmp.lt.s32.totalorder %s1720_s27, 3 }
  0x45   : > { %p287_p4 = pnand %p1358_p2, %p286_p3 }
  0x46   : > { %s1925_s26 = sand.u32 (!%p287_p4), 1, %s1712_s25  }
  0x47   : > { %290 = sbr.rel (%p287_p4) target bundleno = 873 (0x369), region = 44  ;;  %s1928_s16 = sshll.u32 (!%p287_p4), %s1925_s26, 4 }
  0x48   : > { %s293_s23 = scalar_lea.sflag (!%p287_p4), [#allocation3], %s1925_s26  ;;  %s296_s17 = scalar_lea.vmem (!%p287_p4), [#allocation2], %s1928_s16 }
  0x4c   : > { %1699 = dma.done.wait (%p1861_p6), %s293_s23, 256  }
  0x4d   : > { %1701 = vsyncadd (%p1861_p6), %s293_s23, 4294967040  ;;  %s1937_s10 = sshll.u32 %s1843_s28, 1  ;;  %v1411_v0 = vld [vmem:[%s2302_s2 + $0x8] sm:$0xff]  ;;  %s2323_s1 = sld [smem:[#allocation12_spill]]  ;;  %v1410_v1 = vld [vmem:[%s2302_s2] sm:$0xff]  ;;  %vm396_vm0 = vcmask 261120  }
  0x4e   : > { %p351_p11 = scmp.lt.s32.totalorder %s1937_s10, 2  ;;  %v439_v2 = vld [vmem:[%s2303_s3] sm:$0xff]  ;;  %v440_v3 = vld [vmem:[%s2303_s3 + $0x8] sm:$0xff]  ;;  %406 = vmatpush.bf16.msra.mxu0 %v1411_v0  ;;  %vm472_vm1 = vcmask 1043456   ;;  %v441_v9 = vld [vmem:[%s2303_s3 + $0x10] sm:$0xff]  ;;  %vm414_vm2 = vcmask 64512  }
  0x4f   : > { %v372_v4 = vld [vmem:[%s296_s17] sm:$0xff]  ;;  %v373_v5 = vld [vmem:[%s296_s17 + $0x8] sm:$0xff]  ;;  %v449_v6 = vunpack.c.l.b16 %v439_v2  ;;  %v450_v7 = vunpack.c.h.b16 %v439_v2  ;;  %v451_v8 = vunpack.c.l.b16 %v440_v3  ;;  %v452_v12 = vunpack.c.h.b16 %v440_v3  ;;  %s1758_s19 = smov 50   ;;  %s1759_s20 = smov 75  }
  0x50   : > { %s352_s21 = scalar_select %p351_p11, %s1937_s10, 2  ;;  %v453_v13 = vunpack.c.l.b16 %v441_v9  ;;  %v454_v14 = vunpack.c.h.b16 %v441_v9  ;;  %v1962_v15 = vld [vmem:[%s2305_s5 + $0x8] sm:$0xff]  ;;  %v1968_v20 = vld [vmem:[%s2305_s5] sm:$0xff]  ;;  %v442_v21 = vld [vmem:[%s2303_s3 + $0x18] sm:$0xff]  ;;  %v374_v22 = vpack.c.bf16 %v373_v5, %v372_v4  ;;  %vm673_vm3 = vcmask 203776  }
  0x51   : > { %v459_v16 = vpack.c.b16 %v449_v6, %v449_v6  ;;  %v460_v17 = vpack.c.b16 %v450_v7, %v450_v7  ;;  %v461_v18 = vpack.c.b16 %v451_v8, %v451_v8  ;;  %v666_v19 = vperm.slane %v1962_v15, 1  ;;  %s1760_s11 = smov 100   ;;  %s1761_s22 = smov 125   ;;  %v382_v46 = vld [vmem:[%s2304_s4] sm:$0xff]  ;;  %v383_v57 = vld [vmem:[%s2304_s4 + $0x8] sm:$0xff] }
  0x52   : > { %s1363_s14 = sshll.u32 %s352_s21, 3  ;;  %v462_v23 = vpack.c.b16 %v452_v12, %v452_v12  ;;  %v463_v24 = vpack.c.b16 %v453_v13, %v453_v13  ;;  %v464_v25 = vpack.c.b16 %v454_v14, %v454_v14  ;;  %407 = vmatpush.bf16.msra.mxu0 %v1410_v1  ;;  %v665_v32 = vperm.slane %v1968_v20, 1  ;;  %v443_v48 = vld [vmem:[%s2303_s3 + $0x20] sm:$0xff]  ;;  %s1762_s0 = smov 22  }
  0x53   : > { %s354_s29 = scalar_lea.vmem %s2323_s1, %s1363_s14  ;;  %v474_v26 = vsel %vm472_vm1, %v459_v16, 0  ;;  %v477_v27 = vsel %vm472_vm1, %v460_v17, 0  ;;  %v480_v28 = vsel %vm472_vm1, %v461_v18, 0  ;;  %v455_v33 = vunpack.c.l.b16 %v442_v21  ;;  %s1763_s15 = smov 47  }
  0x54   : > { %v375_v10 = vld [vmem:[%s354_s29] sm:$0xff]  ;;  %v376_v11 = vld [vmem:[%s354_s29 + $0x8] sm:$0xff]  ;;  %s1757_s29 = smov 25   ;;  %510 = vmatpush.bf16.msra.mxu1 %v474_v26  ;;  %524 = vmatpush.bf16.msra.mxu2 %v477_v27  ;;  %v483_v30 = vsel %vm472_vm1, %v462_v23, 0  ;;  %v486_v31 = vsel %vm472_vm1, %v463_v24, 0  ;;  %v489_v34 = vsel %vm472_vm1, %v464_v25, 0  ;;  %v456_v45 = vunpack.c.h.b16 %v442_v21 }
  0x55   : > { %v1976_v29 = vpack.c.bf16 %v376_v11, %v375_v10  ;;  %671 = vrot.lane.b32.xlu1 %v666_v19, %s1757_s29  ;;  %538 = vmatpush.bf16.msra.mxu3 %v480_v28  ;;  %v465_v35 = vpack.c.b16 %v455_v33, %v455_v33  ;;  %v717_v36 = vperm.slane %v1962_v15, 2  ;;  %v716_v38 = vperm.slane %v1968_v20, 2  ;;  %s2047_s8 = scalar_lea.vmem [#allocation6], %s1928_s16   ;;  %s1777_s23 = smov 106  }
  0x56   : > { %1372 = vmatmul.msk.bf16.vlgmr.msra.gmra.mxu0 %vm396_vm0, %v374_v22  ;;  %669 = vrot.lane.b32.xlu0 %v665_v32, %s1757_s29  ;;  %v768_v39 = vperm.slane %v1962_v15, 3  ;;  %v767_v40 = vperm.slane %v1968_v20, 3  ;;  %v819_v41 = vperm.slane %v1962_v15, 4  ;;  %v818_v42 = vperm.slane %v1968_v20, 4  ;;  %s1772_s29 = smov 103   ;;  %s1778_s21 = smov 81  }
  0x57   : > { %1373 = vmatmul.msk.bf16.vlgmr.msra.gmra.mxu1 %vm414_vm2, %v1976_v29  ;;  %1374 = vmatmul.msk.bf16.vlgmr.msra.gmra.mxu2 %vm414_vm2, %v1976_v29  ;;  %v492_v37 = vsel %vm472_vm1, %v465_v35, 0  ;;  %v870_v43 = vperm.slane %v1962_v15, 5  ;;  %v869_v44 = vperm.slane %v1968_v20, 5  ;;  %v466_v49 = vpack.c.b16 %v456_v45, %v456_v45  ;;  %s2188_s14 = scalar_lea.vmem [#allocation5], %s1928_s16  ;;  %s2311_s16 = scalar_lea.sflag [#allocation4], %s1925_s26 }
  0x58   : > { %552 = vmatpush.bf16.msrb.mxu1 %v483_v30  ;;  %566 = vmatpush.bf16.msrb.mxu2 %v486_v31  ;;  %v457_v51 = vunpack.c.l.b16 %v443_v48  ;;  %v933_v52 = vperm.slane %v1968_v20, 6  ;;  %v934_v61 = vperm.slane %v1962_v15, 6  ;;  %v458_v3 = vunpack.c.h.b16 %v443_v48  ;;  %s1054_s18 = ssub.s32 (%p1866_p9), 3, %s1937_s10 }
  0x59   : > { %1375 = vmatmul.msk.bf16.vlgmr.msra.gmra.mxu3 %vm414_vm2, %v1976_v29  ;;  %594 = vmatpush.bf16.msrb.mxu0 %v492_v37  ;;  %v495_v53 = vsel %vm472_vm1, %v466_v49, 0  ;;  %v985_v17 = vperm.slane %v1962_v15, 7  ;;  %v984_v18 = vperm.slane %v1968_v20, 7  ;;  %v1764_v19 = vmov 2   ;;  %p1055_p6 = scmp.lt.s32.totalorder (%p1866_p9), %s1054_s18, 2 }
  0x5a   : > { %580 = vmatpush.bf16.msrb.mxu3 %v489_v34  ;;  %722 = vrot.lane.b32.xlu2 %v717_v36, %s1758_s19  ;;  %v467_v55 = vpack.c.b16 %v457_v51, %v457_v51  ;;  %v468_v5 = vpack.c.b16 %v458_v3, %v458_v3  ;;  %v1765_v21 = vmov 0   ;;  %v1766_v30 = vmov 1  }
  0x5b   : > { %1549 = vset.pattern.permute.xlu1 %v1764_v19  ;;  %1547 = vset.pattern.permute.xlu2 %v1765_v21  ;;  %v1767_v31 = vmov 3   ;;  %v1768_v32 = vmov 5   ;;  %v1769_v33 = vmov 4   ;;  %v1770_v34 = vmov 7  }
  0x5c   : > { %608 = vmatpush.bf16.msra.mxu1 %v495_v53  ;;  %v498_v56 = vsel %vm472_vm1, %v467_v55, 0  ;;  %v501_v7 = vsel %vm472_vm1, %v468_v5, 0  ;;  %1557 = vset.pattern.permute.xlu0 %v1764_v19  ;;  %v1771_v35 = vmov 6   ;;  %vm724_vm4 = vcmask 408576  }
  0x5d   : > { %937 = vrot.lane.b32.xlu1 %v933_v52, %s1762_s0  ;;  %622 = vmatpush.bf16.msra.mxu2 %v498_v56  ;;  %vm775_vm5 = vcmask 613376   ;;  %vm826_vm6 = vcmask 818176   ;;  %vm877_vm7 = vcmask 1022976   ;;  %vm941_vm8 = vcmask 179200  }
  0x5e   : > { %720 = vrot.lane.b32.xlu0 %v716_v38, %s1758_s19  ;;  %636 = vmatpush.bf16.msra.mxu3 %v501_v7  ;;  %s1773_s19 = smov 3   ;;  %vm992_vm9 = vcmask 384000   ;;  %vm705_vm10 = vcmask 842752   ;;  %vm756_vm11 = vcmask 637952   ;;  %vm807_vm12 = vcmask 433152  }
  0x5f   : > { %vm858_vm13 = vcmask 228352   ;;  %vm920_vm14 = vcmask 23552   ;;  %vm973_vm15 = vcmask 867328   ;;  %vm1024_vm0 = vcmask 662528  }
  0x62   : > { %773 = vrot.lane.b32.xlu2 %v768_v39, %s1759_s20 }
  0x66   : > { %1379 = vmatmul.msk.bf16.vlgmr.msrb.gmra.mxu0 %vm414_vm2, %v1976_v29  ;;  %771 = vrot.lane.b32.xlu0 %v767_v40, %s1759_s20  ;;  %s1774_s20 = smov 78  }
  0x67   : > { %1376 = vmatmul.msk.bf16.vlgmr.msrb.gmra.mxu1 %vm414_vm2, %v1976_v29  ;;  %1377 = vmatmul.msk.bf16.vlgmr.msrb.gmra.mxu2 %vm414_vm2, %v1976_v29 }
  0x69   : > { %1378 = vmatmul.msk.bf16.vlgmr.msrb.gmra.mxu3 %vm414_vm2, %v1976_v29 }
  0x6a   : > { %824 = vrot.lane.b32.xlu2 %v819_v41, %s1760_s11 }
  0x6e   : > { %822 = vrot.lane.b32.xlu0 %v818_v42, %s1760_s11  ;;  %s1775_s11 = smov 53  }
  0x72   : > { %875 = vrot.lane.b32.xlu2 %v870_v43, %s1761_s22  ;;  %v645_v43 = vperm.slane %v1968_v20, 0 }
  0x76   : > { %873 = vrot.lane.b32.xlu0 %v869_v44, %s1761_s22  ;;  %v646_v44 = vperm.slane %v1962_v15, 0  ;;  %s1776_s22 = smov 28  }
  0x77   : > { %1380 = vmatmul.msk.bf16.vlgmr.msra.gmra.mxu1 %vm414_vm2, %v1976_v29  ;;  %1381 = vmatmul.msk.bf16.vlgmr.msra.gmra.mxu2 %vm414_vm2, %v1976_v29 }
  0x79   : > { %1382 = vmatmul.msk.bf16.vlgmr.msra.gmra.mxu3 %vm414_vm2, %v1976_v29 }
  0x7a   : > { %990 = vrot.lane.b32.xlu2 %v985_v17, %s1763_s15 }
  0xb4   : > { %v723_v36 = vpop.permute.xlu2 %722 }
  0xbc   : > { %v774_v37 = vpop.permute.xlu2 %773 }
  0xc4   : > { %v2053_v38 = vpop.permute.xlu2 %824 }
  0xc7   : > { %v2042_v22 = vpop.permute.xlu1 %671 }
  0xc8   : > { %v2025_v62 = vpop.permute.xlu0 %669 }
  0xc9   : > { %v2067_v52 = vsel %vm673_vm3, %v2025_v62, %v2042_v22 }
  0xcc   : > { %v2055_v40 = vpop.permute.xlu2 %875 }
  0xcf   : > { %v2044_v23 = vpop.permute.xlu1 %937 }
  0xd0   : > { %v2027_v63 = vpop.permute.xlu0 %720 }
  0xd3   : > { %v409_v47 = vpop.f32.mrf.mxu0 }
  0xd4   : > { %v410_v50 = vadd.f32 %v409_v47, %v382_v46  ;;  %v512_v39 = vpop.f32.mrf.mxu1  ;;  %v2057_v42 = vpop.permute.xlu2 %990 }
  0xd5   : > { %v647_v46 = vadd.f32 %v645_v43, %v512_v39 }
  0xd6   : > { %v415_v54 = vsel %vm414_vm2, %v410_v50, -inf }
  0xd7   : > { %416 = vmax.xlane.f32.xlu0 %v415_v54 }
  0xd8   : > { %v2029_v0 = vpop.permute.xlu0 %771 }
  0xda   : > { %v526_v45 = vpop.f32.mrf.mxu2 }
  0xdb   : > { %v411_v58 = vpop.f32.mrf.mxu0  ;;  %v648_v47 = vadd.f32 %v646_v44, %v526_v45  ;;  %v677_v54 = vadd.f32 %v2025_v62, %v526_v45 }
  0xdc   : > { %v412_v59 = vadd.f32 %v411_v58, %v383_v57  ;;  %v514_v41 = vpop.f32.mrf.mxu1  ;;  %v540_v53 = vpop.f32.mrf.mxu3 }
  0xdd   : > { %v678_v20 = vadd.f32 %v2067_v52, %v540_v53 }
  0xde   : > { %v418_v60 = vsel %vm414_vm2, %v412_v59, -inf }
  0xdf   : > { %419 = vmax.xlane.f32.xlu0 %v418_v60 }
  0xe0   : > { %v2031_v1 = vpop.permute.xlu0 %822 }
  0xe4   : > { %v554_v48 = vpop.f32.mrf.mxu1 }
  0xe5   : > { %v779_v17 = vadd.f32 %v2029_v0, %v554_v48 }
  0xe8   : > { %v2033_v2 = vpop.permute.xlu0 %873 }
  0xec   : > { %v2071_v15 = vpop.f32.mrf.mxu1 }
  0xf3   : > { %939 = vrot.lane.b32.xlu0 %v934_v61, %s1762_s0  ;;  %v2080_v61 = vsel %vm724_vm4, %v2027_v63, %v723_v36 }
  0xf4   : > { %v2075_v58 = vpop.f32.mrf.mxu1  ;;  %v729_v7 = vadd.f32 %v2080_v61, %v554_v48 }
  0xfb   : > { %988 = vrot.lane.b32.xlu0 %v984_v18, %s1763_s15 }
 0x14a   : > { %v417_v4 = vpop.xlane.xlu0 %416 }
 0x14b   : > { %v421_v6 = vsub.f32 %v410_v50, %v417_v4  ;;  %v2082_v4 = vpop.f32.mrf.mxu2 }
 0x14d   : > { %v423_v8 = vmul.f32 1.442695, %v421_v6  ;;  %v728_v6 = vadd.f32 %v2027_v63, %v540_v53  ;;  %v945_v53 = vadd.f32 %v2044_v23, %v2075_v58 }
 0x14f   : > { %1564 = vpow2.f32 %v423_v8 }
 0x152   : > { %v420_v9 = vpop.xlane.xlu0 %419 }
 0x153   : > { %v422_v10 = vsub.f32 %v412_v59, %v420_v9  ;;  %v884_v59 = vadd.f32 %v2055_v40, %v2075_v58  ;;  %v679_v58 = vadd.f32 %v2025_v62, %v2082_v4 }
 0x155   : > { %v1565_v11 = vpop.eup %1564  ;;  %v425_v12 = vmul.f32 1.442695, %v422_v10 }
 0x156   : > { %v427_v13 = vsel %vm414_vm2, %v1565_v11, 0.0 }
 0x157   : > { %1566 = vpow2.f32 %v425_v12  ;;  %428 = vadd.xlane.f32.xlu1 %v427_v13  ;;  %v2092_v12 = vsel %vm775_vm5, %v2029_v0, %v774_v37  ;;  %v2119_v37 = vsel %vm877_vm7, %v2033_v2, %v2055_v40 }
 0x15d   : > { %v1567_v14 = vpop.eup %1566 }
 0x15e   : > { %v430_v16 = vsel %vm414_vm2, %v1567_v14, 0.0 }
 0x15f   : > { %431 = vadd.xlane.f32.xlu1 %v430_v16  ;;  %v2096_v16 = vpop.f32.mrf.mxu3 }
 0x160   : > { %v730_v62 = vadd.f32 %v2027_v63, %v2096_v16  ;;  %v781_v63 = vadd.f32 %v2029_v0, %v2071_v15 }
 0x165   : > { %v940_v5 = vpop.permute.xlu0 %939 }
 0x166   : > { %v942_v48 = vsel %vm941_vm8, %v2044_v23, %v940_v5 }
 0x16d   : > { %v2094_v13 = vpop.permute.xlu0 %988 }
 0x1ca   : > { %v429_v24 = vpop.xlane.xlu1 %428 }
 0x1cb   : > { %1568 = vrcp.f32 %v429_v24  ;;  %v649_v24 = vadd.f32 %v645_v43, %v514_v41  ;;  %v596_v41 = vpop.f32.mrf.mxu0 }
 0x1d1   : > { %v1569_v25 = vpop.eup %1568 }
 0x1d2   : > { %v435_v26 = vmul.f32 %v1569_v25, %v1565_v11  ;;  %v432_v27 = vpop.xlane.xlu1 %431  ;;  %v650_v25 = vadd.f32 %v646_v44, %v2082_v4  ;;  %v883_v44 = vadd.f32 %v2119_v37, %v596_v41  ;;  %v993_v4 = vsel %vm992_vm9, %v2094_v13, %v2057_v42 }
 0x1d3   : > { %1570 = vrcp.f32 %v432_v27 }
 0x1d4   : > { %437 = vst.msk [vmem:[%s2047_s8] sm:$0xff] %vm414_vm2, %v435_v26  ;;  %653 = vperm.xlu2 %1547, %v435_v26   ;;  %733 = vperm.xlu1 %1549, %v435_v26  }
 0x1d9   : > { %v1571_v28 = vpop.eup %1570 }
 0x1da   : > { %v436_v29 = vmul.f32 %v1571_v28, %v1567_v14  ;;  %v568_v14 = vpop.f32.mrf.mxu2  ;;  %v2107_v28 = vsel %vm826_vm6, %v2031_v1, %v2053_v38 }
 0x1db   : > { %v780_v18 = vadd.f32 %v2092_v12, %v568_v14 }
 0x1dc   : > { %438 = vst.msk [vmem:[%s2047_s8 + $0x8] sm:$0xff] %vm414_vm2, %v436_v29  ;;  %1548 = vset.pattern.permute.xlu2 %v1766_v30  ;;  %1550 = vset.pattern.permute.xlu1 %v1767_v31  ;;  %vm1037_vm2 = vcmask 203780  }
 0x1dd   : > { %737 = vperm.xlu0 %1557, %v436_v29   ;;  %682 = vperm.xlu2 %1548, %v435_v26   ;;  %vm2183_vm3 = vmor %vm1037_vm2, %vm472_vm1 }
 0x1de   : > { %784 = vperm.xlu1 %1550, %v435_v26  }
 0x1e2   : > { %v570_v39 = vpop.f32.mrf.mxu2 }
 0x1e5   : > { %1558 = vset.pattern.permute.xlu0 %v1767_v31  ;;  %1552 = vset.pattern.permute.xlu2 %v1768_v32  ;;  %v582_v31 = vpop.f32.mrf.mxu3 }
 0x1e6   : > { %1551 = vset.pattern.permute.xlu1 %v1769_v33  ;;  %788 = vperm.xlu0 %1558, %v436_v29   ;;  %v882_v43 = vadd.f32 %v2033_v2, %v582_v31 }
 0x1e7   : > { %889 = vperm.xlu2 %1552, %v435_v26   ;;  %835 = vperm.xlu1 %1551, %v435_v26  }
 0x1ee   : > { %1559 = vset.pattern.permute.xlu0 %v1769_v33  ;;  %v831_v33 = vadd.f32 %v2107_v28, %v582_v31  ;;  %v598_v31 = vpop.f32.mrf.mxu0 }
 0x1ef   : > { %1554 = vset.pattern.permute.xlu2 %v1770_v34  ;;  %1553 = vset.pattern.permute.xlu1 %v1771_v35 }
 0x1f0   : > { %839 = vperm.xlu0 %1559, %v436_v29   ;;  %1001 = vperm.xlu2 %1554, %v435_v26  }
 0x1f1   : > { %950 = vperm.xlu1 %1553, %v435_v26  }
 0x1f8   : > { %1561 = vset.pattern.permute.xlu0 %v1771_v35  ;;  %1555 = vset.pattern.permute.xlu2 %v1765_v21 }
 0x1f9   : > { %1560 = vset.pattern.permute.xlu1 %v1768_v32  ;;  %954 = vperm.xlu0 %1561, %v436_v29   ;;  %v830_v32 = vadd.f32 %v2031_v1, %v568_v14 }
 0x1fa   : > { %893 = vperm.xlu1 %1560, %v436_v29   ;;  %658 = vperm.xlu2 %1555, %v436_v29  }
 0x201   : > { %1563 = vset.pattern.permute.xlu0 %v1770_v34 }
 0x202   : > { %1562 = vset.pattern.permute.xlu1 %v1770_v34  ;;  %1556 = vset.pattern.permute.xlu2 %v1766_v30 }
 0x203   : > { %1005 = vperm.xlu1 %1562, %v436_v29   ;;  %686 = vperm.xlu2 %1556, %v436_v29  }
 0x22e   : > { %v654_v49 = vpop.permute.xlu2 %653 }
 0x22f   : > { %v2061_v50 = vmul.f32 %v654_v49, %v647_v46  ;;  %v2063_v51 = vmul.f32 %v654_v49, %v648_v47  ;;  %v624_v49 = vpop.f32.mrf.mxu2 }
 0x230   : > { %v996_v5 = vadd.f32 %v2094_v13, %v624_v49 }
 0x237   : > { %v683_v55 = vpop.permute.xlu2 %682 }
 0x238   : > { %v689_v56 = vmul.f32 %v683_v55, %v677_v54  ;;  %v690_v57 = vmul.f32 %v683_v55, %v678_v20  ;;  %v946_v54 = vadd.f32 %v942_v48, %v624_v49  ;;  %v612_v55 = vpop.f32.mrf.mxu1 }
 0x23a   : > { %699 = vrot.lane.b32.xlu0 %v690_v57, %s1772_s29  ;;  %697 = vrot.lane.b32.xlu2 %v689_v56, %s1772_s29 }
 0x241   : > { %v890_v60 = vpop.permute.xlu2 %889 }
 0x242   : > { %v898_v3 = vmul.f32 %v890_v60, %v884_v59  ;;  %v896_v45 = vmul.f32 %v890_v60, %v882_v43  ;;  %v897_v46 = vmul.f32 %v890_v60, %v883_v44  ;;  %v887_v59 = vadd.f32 %v2055_v40, %v612_v55 }
 0x244   : > { %912 = vrot.lane.b32.xlu0 %v898_v3, %s1773_s19 }
 0x246   : > { %v734_v8 = vpop.permute.xlu1 %733 }
 0x247   : > { %v740_v9 = vmul.f32 %v734_v8, %v728_v6  ;;  %v741_v10 = vmul.f32 %v734_v8, %v729_v7  ;;  %v584_v7 = vpop.f32.mrf.mxu3 }
 0x248   : > { %v885_v0 = vadd.f32 %v2033_v2, %v584_v7 }
 0x249   : > { %750 = vrot.lane.b32.xlu1 %v741_v10, %s1774_s20  ;;  %748 = vrot.lane.b32.xlu2 %v740_v9, %s1774_s20  ;;  %v947_v10 = vadd.f32 %v2044_v23, %v612_v55 }
 0x24a   : > { %v2089_v11 = vpop.permute.xlu2 %1001 }
 0x24b   : > { %v1008_v8 = vmul.f32 %v2089_v11, %v996_v5 }
 0x24f   : > { %v2103_v26 = vpop.permute.xlu0 %737 }
 0x250   : > { %v785_v19 = vpop.permute.xlu1 %784  ;;  %v742_v23 = vmul.f32 %v2103_v26, %v730_v62 }
 0x251   : > { %v791_v21 = vmul.f32 %v785_v19, %v779_v17  ;;  %v792_v22 = vmul.f32 %v785_v19, %v780_v18  ;;  %v680_v17 = vadd.f32 %v2067_v52, %v2096_v16  ;;  %v638_v18 = vpop.f32.mrf.mxu3  ;;  %v731_v52 = vadd.f32 %v2080_v61, %v2071_v15 }
 0x252   : > { %v833_v61 = vadd.f32 %v2107_v28, %v584_v7 }
 0x253   : > { %801 = vrot.lane.b32.xlu1 %v792_v22, %s1775_s11  ;;  %799 = vrot.lane.b32.xlu2 %v791_v21, %s1775_s11  ;;  %v997_v21 = vadd.f32 %v993_v4, %v638_v18  ;;  %v743_v42 = vmul.f32 %v2103_v26, %v731_v52 }
 0x254   : > { %v659_v27 = vpop.permute.xlu2 %658 }
 0x255   : > { %v2109_v29 = vmul.f32 %v659_v27, %v649_v24  ;;  %v2111_v30 = vmul.f32 %v659_v27, %v650_v25  ;;  %v1009_v22 = vmul.f32 %v2089_v11, %v997_v21  ;;  %v782_v24 = vadd.f32 %v2092_v12, %v570_v39  ;;  %v626_v12 = vpop.f32.mrf.mxu2 }
 0x256   : > { %v832_v25 = vadd.f32 %v2031_v1, %v570_v39  ;;  %v886_v1 = vadd.f32 %v2119_v37, %v598_v31  ;;  %v998_v2 = vadd.f32 %v2094_v13, %v626_v12 }
 0x258   : > { %v789_v38 = vpop.permute.xlu0 %788 }
 0x259   : > { %v836_v34 = vpop.permute.xlu1 %835  ;;  %v793_v16 = vmul.f32 %v789_v38, %v781_v63  ;;  %v794_v11 = vmul.f32 %v789_v38, %v782_v24  ;;  %v640_v28 = vpop.f32.mrf.mxu3 }
 0x25a   : > { %v842_v35 = vmul.f32 %v836_v34, %v830_v32  ;;  %v843_v36 = vmul.f32 %v836_v34, %v831_v33  ;;  %v948_v32 = vadd.f32 %v942_v48, %v626_v12 }
 0x25c   : > { %852 = vrot.lane.b32.xlu1 %v843_v36, %s1776_s22  ;;  %850 = vrot.lane.b32.xlu2 %v842_v35, %s1776_s22  ;;  %v999_v36 = vadd.f32 %v993_v4, %v640_v28 }
 0x25d   : > { %v687_v6 = vpop.permute.xlu2 %686 }
 0x25e   : > { %v691_v9 = vmul.f32 %v687_v6, %v679_v58  ;;  %v692_v19 = vmul.f32 %v687_v6, %v680_v17 }
 0x262   : > { %v840_v20 = vpop.permute.xlu0 %839 }
 0x263   : > { %v951_v47 = vpop.permute.xlu1 %950  ;;  %v844_v27 = vmul.f32 %v840_v20, %v832_v25  ;;  %v845_v15 = vmul.f32 %v840_v20, %v833_v61 }
 0x264   : > { %910 = vrot.lane.b32.xlu1 %v897_v46, %s1773_s19  ;;  %908 = vrot.lane.b32.xlu2 %v896_v45, %s1773_s19  ;;  %v957_v56 = vmul.f32 %v951_v47, %v945_v53  ;;  %v958_v57 = vmul.f32 %v951_v47, %v946_v54 }
 0x26b   : > { %v955_v40 = vpop.permute.xlu0 %954 }
 0x26c   : > { %v894_v3 = vpop.permute.xlu1 %893  ;;  %965 = vrot.lane.b32.xlu2 %v957_v56, %s1777_s23  ;;  %967 = vrot.lane.b32.xlu1 %v958_v57, %s1777_s23  ;;  %v959_v14 = vmul.f32 %v955_v40, %v947_v10  ;;  %v960_v33 = vmul.f32 %v955_v40, %v948_v32 }
 0x26d   : > { %v901_v60 = vmul.f32 %v894_v3, %v887_v59  ;;  %v899_v26 = vmul.f32 %v894_v3, %v885_v0  ;;  %v900_v34 = vmul.f32 %v894_v3, %v886_v1 }
 0x26f   : > { %918 = vrot.lane.b32.xlu0 %v901_v60, %s1773_s19 }
 0x274   : > { %701 = vrot.lane.b32.xlu2 %v691_v9, %s1772_s29  ;;  %1016 = vrot.lane.b32.xlu1 %v1008_v8, %s1778_s21 }
 0x275   : > { %v1006_v35 = vpop.permute.xlu1 %1005 }
 0x276   : > { %v1010_v39 = vmul.f32 %v1006_v35, %v998_v2  ;;  %v1011_v41 = vmul.f32 %v1006_v35, %v999_v36 }
 0x277   : > { %969 = vrot.lane.b32.xlu0 %v959_v14, %s1777_s23 }
 0x27c   : > { %703 = vrot.lane.b32.xlu1 %v692_v19, %s1772_s29  ;;  %752 = vrot.lane.b32.xlu2 %v742_v23, %s1774_s20 }
 0x27f   : > { %1018 = vrot.lane.b32.xlu0 %v1009_v22, %s1778_s21 }
 0x284   : > { %754 = vrot.lane.b32.xlu1 %v743_v42, %s1774_s20  ;;  %803 = vrot.lane.b32.xlu2 %v793_v16, %s1775_s11 }
 0x28c   : > { %805 = vrot.lane.b32.xlu1 %v794_v11, %s1775_s11  ;;  %854 = vrot.lane.b32.xlu2 %v844_v27, %s1776_s22 }
 0x294   : > { %856 = vrot.lane.b32.xlu1 %v845_v15, %s1776_s22  ;;  %914 = vrot.lane.b32.xlu2 %v899_v26, %s1773_s19  ;;  %v698_v38 = vpop.permute.xlu2 %697 }
 0x29c   : > { %916 = vrot.lane.b32.xlu1 %v900_v34, %s1773_s19  ;;  %971 = vrot.lane.b32.xlu2 %v960_v33, %s1777_s23 }
 0x2a3   : > { %v749_v37 = vpop.permute.xlu2 %748 }
 0x2a4   : > { %1022 = vrot.lane.b32.xlu1 %v1011_v41, %s1778_s21  ;;  %1020 = vrot.lane.b32.xlu2 %v1010_v39, %s1778_s21 }
 0x2ac   : > { %v700_v49 = vpop.permute.xlu0 %699 }
 0x2ad   : > { %v800_v43 = vpop.permute.xlu2 %799  ;;  %v706_v57 = vsel %vm705_vm10, %v698_v38, %v700_v49  ;;  %v713_v3 = vadd.f32 %v700_v49, %v2063_v51 }
 0x2ae   : > { %v712_v6 = vadd.f32 %v706_v57, %v2061_v50 }
 0x2b6   : > { %v851_v45 = vpop.permute.xlu2 %850  ;;  %v913_v20 = vpop.permute.xlu0 %912 }
 0x2bb   : > { %v751_v44 = vpop.permute.xlu1 %750 }
 0x2bc   : > { %v757_v60 = vsel %vm756_vm11, %v749_v37, %v751_v44  ;;  %v764_v58 = vadd.f32 %v751_v44, %v713_v3 }
 0x2bd   : > { %v763_v8 = vadd.f32 %v757_v60, %v712_v6 }
 0x2be   : > { %v909_v47 = vpop.permute.xlu2 %908 }
 0x2c5   : > { %v802_v46 = vpop.permute.xlu1 %801 }
 0x2c6   : > { %v966_v53 = vpop.permute.xlu2 %965  ;;  %v808_v7 = vsel %vm807_vm12, %v800_v43, %v802_v46  ;;  %v815_v40 = vadd.f32 %v802_v46, %v764_v58 }
 0x2c7   : > { %v814_v14 = vadd.f32 %v808_v7, %v763_v8 }
 0x2ce   : > { %v853_v48 = vpop.permute.xlu1 %852  ;;  %v702_v13 = vpop.permute.xlu2 %701 }
 0x2cf   : > { %v859_v10 = vsel %vm858_vm13, %v851_v45, %v853_v48  ;;  %v866_v51 = vadd.f32 %v853_v48, %v815_v40 }
 0x2d0   : > { %v865_v4 = vadd.f32 %v859_v10, %v814_v14 }
 0x2d6   : > { %v911_v54 = vpop.permute.xlu1 %910  ;;  %v753_v59 = vpop.permute.xlu2 %752 }
 0x2d7   : > { %v922_v17 = vsel %vm920_vm14, %v911_v54, %v913_v20  ;;  %v921_v62 = vsel %vm920_vm14, %v909_v47, %v911_v54 }
 0x2d8   : > { %v930_v18 = vadd.f32 %v922_v17, %v866_v51  ;;  %v929_v21 = vadd.f32 %v921_v62, %v865_v4 }
 0x2de   : > { %v968_v55 = vpop.permute.xlu1 %967  ;;  %v804_v23 = vpop.permute.xlu2 %803 }
 0x2df   : > { %v974_v50 = vsel %vm973_vm15, %v966_v53, %v968_v55  ;;  %v981_v22 = vadd.f32 %v968_v55, %v930_v18 }
 0x2e0   : > { %v980_v52 = vadd.f32 %v974_v50, %v929_v21 }
 0x2e1   : > { %v919_v56 = vpop.permute.xlu0 %918 }
 0x2e6   : > { %v1017_v5 = vpop.permute.xlu1 %1016  ;;  %v855_v61 = vpop.permute.xlu2 %854 }
 0x2e9   : > { %v970_v9 = vpop.permute.xlu0 %969 }
 0x2ee   : > { %v704_v19 = vpop.permute.xlu1 %703  ;;  %v915_v15 = vpop.permute.xlu2 %914 }
 0x2ef   : > { %v707_v31 = vsel %vm705_vm10, %v702_v13, %v704_v19  ;;  %v715_v12 = vadd.f32 %v704_v19, %v2111_v30 }
 0x2f0   : > { %v714_v32 = vadd.f32 %v707_v31, %v2109_v29 }
 0x2f1   : > { %v1019_v63 = vpop.permute.xlu0 %1018 }
 0x2f2   : > { %v1025_v42 = vsel %vm1024_vm0, %v1017_v5, %v1019_v63  ;;  %v1032_v16 = vadd.f32 %v1019_v63, %v981_v22 }
 0x2f3   : > { %v1031_v24 = vadd.f32 %v1025_v42, %v980_v52 }
 0x2f5   : > { %v1035_v11 = vpack.c.bf16 %v1032_v16, %v1031_v24 }
 0x2f6   : > { %v755_v27 = vpop.permute.xlu1 %754  ;;  %v972_v35 = vpop.permute.xlu2 %971 }
 0x2f7   : > { %1039 = vst.msk [vmem:[%s2188_s14] sm:$0xff] %vm2183_vm3, %v1035_v11  ;;  %v758_v1 = vsel %vm756_vm11, %v753_v59, %v755_v27  ;;  %v766_v33 = vadd.f32 %v755_v27, %v715_v12  ;;  %v975_v45 = vsel %vm973_vm15, %v970_v9, %v972_v35 }
 0x2f8   : > { %v765_v28 = vadd.f32 %v758_v1, %v714_v32 }
 0x2fe   : > { %v806_v0 = vpop.permute.xlu1 %805  ;;  %v1021_v47 = vpop.permute.xlu2 %1020 }
 0x2ff   : > { %v809_v34 = vsel %vm807_vm12, %v804_v23, %v806_v0  ;;  %v817_v2 = vadd.f32 %v806_v0, %v766_v33 }
 0x300   : > { %v816_v38 = vadd.f32 %v809_v34, %v765_v28 }
 0x306   : > { %v857_v26 = vpop.permute.xlu1 %856 }
 0x307   : > { %v860_v36 = vsel %vm858_vm13, %v855_v61, %v857_v26  ;;  %v868_v41 = vadd.f32 %v857_v26, %v817_v2 }
 0x308   : > { %v867_v43 = vadd.f32 %v860_v36, %v816_v38 }
 0x30e   : > { %v917_v39 = vpop.permute.xlu1 %916 }
 0x30f   : > { %v923_v37 = vsel %vm920_vm14, %v915_v15, %v917_v39  ;;  %v924_v30 = vsel %vm920_vm14, %v917_v39, %v919_v56 }
 0x310   : > { %v932_v44 = vadd.f32 %v924_v30, %v868_v41  ;;  %v931_v29 = vadd.f32 %v923_v37, %v867_v43 }
 0x312   : > { %v983_v46 = vadd.f32 %v972_v35, %v932_v44  ;;  %v982_v49 = vadd.f32 %v975_v45, %v931_v29 }
 0x316   : > { %v1023_v48 = vpop.permute.xlu1 %1022 }
 0x317   : > { %v1026_v53 = vsel %vm1024_vm0, %v1021_v47, %v1023_v48  ;;  %v1034_v54 = vadd.f32 %v1023_v48, %v983_v46 }
 0x318   : > { %v1033_v20 = vadd.f32 %v1026_v53, %v982_v49  ;;  %1052 = sbr.rel (!%p1866_p9) target bundleno = 829 (0x33d), region = 52 }
 0x31a   : > { %v1036_v13 = vpack.c.bf16 %v1034_v54, %v1033_v20 }
 0x31c   : > { %1040 = vst.msk [vmem:[%s2188_s14 + $0x8] sm:$0xff] %vm2183_vm3, %v1036_v13 }
 0x31d   : > { %s2339_s18 = smov (!%p1055_p6, %s1054_s18), 2 }
 0x31e   : > { %s1412_s0 = sshll.u32 %s2339_s18, 3 }
 0x31f   : > { %s1059_s17 = ssub.s32 16, %s1412_s0 }
 0x320   : > { %s1060_s9 = sshll.u32 %s1059_s17, 4 }
 0x321   : > { %1061 = vsyncadd %s2311_s16, %s1060_s9  ;;  %p2215_p13 = scmp.ne.s32.totalorder %s1412_s0, 0  ;;  %s1414_s29 = sshll.u32 %s1843_s28, 4 }
 0x322   : > { %s1065_s11 = scalar_lea.hbm %s2306_s6, %s1414_s29  ;;  %s1067_s22 = sshll.u32 %s2188_s14, 4  ;;  %s2224_s22 = int_to_ptr.vmem [resolvable:$true] %s1067_s22 }
 0x323   : > { %s1069_s23 = sshll.u32 %s1065_s11, 4  ;;  %s2312_s21 = sshll.u32 %s2339_s18, 7  ;;  %s2226_s23 = int_to_ptr.hbm [resolvable:$true] %s1069_s23 }
 0x324   : > { %s1611_s17 = sshra.s32 %s2224_s22, 4  ;;  %s1613_s0 = sshrl.u32 %s2312_s21, 4  ;;  %s1612_s17 = int_to_ptr.vmem [resolvable:$true] %s1611_s17 }
 0x325   : > { %s1618_s9 = scalar_lea.vmem %s1612_s17, %s1613_s0  ;;  %s1779_s16 = smov [#allocation5]  }
 0x326   : > { %p1619_p5 = scmp.ne.s32.totalorder %s1612_s17, %s1618_s9  ;;  %s1622_s19 = scalar_lea.vmem %s1779_s16, 32 }
 0x327   : > { %p1624_p12 = scmp.lt.s32.totalorder %s1622_s19, %s1618_s9 }
 0x328   : > { %p1620_p7 = pnand %p1619_p5, %p2215_p13 }
 0x32a   : > { %p1621_p8 = pneg %p1620_p7 }
 0x32c   : > { %p1626_p0 = pnand %p1624_p12, %p1621_p8 }
 0x32e   : > { %1629 = shalt.err (!%p1626_p0)
}
 0x32f   : > { %s1630_s14 = sshra.s32 %s2226_s23, 4  ;;  %s1641_s17 = scalar_lea.hbm %s2306_s6, 24  ;;  %s1631_s14 = int_to_ptr.hbm [resolvable:$true] %s1630_s14 }
 0x330   : > { %s1637_s29 = scalar_lea.hbm %s1631_s14, %s1613_s0  ;;  %p1642_p4 = scmp.lt.s32.totalorder %s1631_s14, %s2306_s6 }
 0x331   : > { %p1638_p1 = scmp.ne.s32.totalorder %s1631_s14, %s1637_s29  ;;  %p1643_p11 = scmp.lt.s32.totalorder %s1641_s17, %s1637_s29 }
 0x333   : > { %p1639_p2 = pnand %p1638_p1, %p2215_p13  ;;  %p1644_p6 = por %p1643_p11, %p1642_p4 }
 0x335   : > { %p1640_p3 = pneg %p1639_p2 }
 0x337   : > { %p1645_p5 = pnand %p1644_p6, %p1640_p3 }
 0x339   : > { %1648 = shalt.err (!%p1645_p5)
}
 0x33a   : > { %s1780_s16 = smov 128   ;;  %s1781_s0 = smov 8  }
 0x33b   : > { %s2327_s9 = scalar_lea.sflag [#allocation4], %s1925_s26  ;;  %s2328_s19 = sshll.u32 %s2339_s18, 7 }
 0x33c   : > { %1075 = dma.vmem_to_hbm [thread:$0]  (%p2215_p13), %s2224_s22, %s2328_s19, %s2226_s23, %s2327_s9, %s1780_s16, %s1780_s16, %s1781_s0  }
 0x33d PF: > { %1078 = sbr.rel (!%p1866_p9) target bundleno = 873 (0x369), region = 56  ;;  %s1080_s1 = ssub.s32 (%p1866_p9), 3, %s1937_s10 }
 0x33e   : > { %s1415_s21 = sshll.u32 (%p1866_p9), %s1843_s28, 4  ;;  %p1081_p7 = scmp.lt.s32.totalorder (%p1866_p9), %s1080_s1, 2 }
 0x33f   : > { %s2258_s20 = scalar_lea.vmem (%p1866_p9), %s2307_s7, %s1415_s21  }
 0x342   : > { %s2341_s1 = smov (!%p1081_p7, %s1080_s1), 2 }
 0x343   : > { %s1394_s26 = sshll.u32 %s2341_s1, 3 }
 0x344   : > { %p1397_p8 = scmp.eq.s32.totalorder %s1394_s26, 0 }
 0x345   : > { %s2264_s18 = sshrl.u32 (!%p1397_p8), %s2341_s1, 1 }
 0x346   : > { %1089 = sbr.rel (%p1397_p8) target bundleno = 873 (0x369), region = 60  ;;  %p1398_p9 = scmp.le.s32.totalorder (!%p1397_p8), %s2264_s18, 0 }
 0x34b   : > { %1286 = sbr.rel (%p1398_p9) target bundleno = 856 (0x358), region = 158  ;;  %s1722_s28 = smov (!%p1398_p9), %s2258_s20  }
 0x34c   : > { %s1726_s12 = smov (!%p1398_p9), %s2047_s8   ;;  %s1730_s10 = smov (!%p1398_p9), 0  }
 0x34d   : > { %s1734_s15 = smov (!%p1398_p9), 0  }
 0x350 LB: >> { %v1154_v55 = vld [vmem:[%s1728_s12] sm:$0xff]  ;;  %v1156_v56 = vld [vmem:[%s1728_s12 + $0x8] sm:$0xff]  ;;  %s1158_s22 = sadd.s32 1, %s1732_s10  ;;  %s1148_s15 = sadd.s32 1, %s1736_s15   ;;  %s1736_s15 = sphi %s1734_s15, %s1148_s15   ;;  %s1732_s10 = sphi %s1730_s10, %s1731_s10   ;;  %s1728_s12 = sphi %s1726_s12, %s1163_s12   ;;  %s1724_s28 = sphi %s1722_s28, %s1164_s28  }
 0x351   : >> { %1155 = vst [vmem:[%s1724_s28] sm:$0xff] %v1154_v55  ;;  %p1159_p13 = scmp.ge.s32.totalorder %s1158_s22, %s2264_s18  ;;  %p1147_p12 = scmp.ge.s32.totalorder %s1148_s15, %s2264_s18 }
 0x352   : >> { %1157 = vst [vmem:[%s1724_s28 + $0x8] sm:$0xff] %v1156_v56 }
 0x353   : >> { %s2343_s22 = smov (%p1159_p13, %s1158_s22), 0  ;;  %1150 = sbr.rel (!%p1147_p12) target bundleno = 848 (0x350), region = 164 }
 0x354   : >> { %s1399_s23 = sshll.u32 %s2343_s22, 4  ;;  %s1731_s10 = smov %s2343_s22  }
 0x355   : >> { %s1163_s12 = scalar_lea.vmem %s2047_s8, %s1399_s23 [#allocation6]   ;;  %s1164_s28 = scalar_lea.vmem %s2258_s20, %s1399_s23  }
 0x358 PF: > { %s2274_s11 = sand.u32 1, %s2341_s1   ;;  %s1416_s17 = sshll.u32 %s2264_s18, 4 }
 0x359   : > { %s1169_s16 = scalar_lea.vmem %s2047_s8, %s1416_s17 [#allocation6]   ;;  %s1171_s0 = scalar_lea.vmem %s2258_s20, %s1416_s17  }
 0x35a   : > { %p1404_p0 = scmp.le.s32.totalorder %s2274_s11, 0 }
 0x35b   : > { %s1738_s9 = smov (!%p1404_p0), %s1171_s0   ;;  %s1742_s19 = smov (!%p1404_p0), %s1169_s16  }
 0x35c   : > { %1300 = sbr.rel (%p1404_p0) target bundleno = 873 (0x369), region = 169  ;;  %s1746_s21 = smov (!%p1404_p0), 0  }
 0x35d   : > { %s1750_s14 = smov (!%p1404_p0), 0  }
 0x361 LB: >> { %v1181_v57 = vld [vmem:[%s1744_s19] sm:$0xff]  ;;  %s1183_s1 = sadd.s32 1, %s1748_s21  ;;  %s1175_s14 = sadd.s32 1, %s1752_s14   ;;  %s1752_s14 = sphi %s1750_s14, %s1175_s14   ;;  %s1748_s21 = sphi %s1746_s21, %s1747_s21   ;;  %s1744_s19 = sphi %s1742_s19, %s1188_s19   ;;  %s1740_s9 = sphi %s1738_s9, %s1189_s9  }
 0x362   : >> { %1182 = vst [vmem:[%s1740_s9] sm:$0xff] %v1181_v57  ;;  %p1184_p1 = scmp.ge.s32.totalorder %s1183_s1, %s2274_s11  ;;  %p1174_p2 = scmp.ge.s32.totalorder %s1175_s14, %s2274_s11 }
 0x364   : >> { %s2345_s1 = smov (%p1184_p1, %s1183_s1), 0  ;;  %1177 = sbr.rel (!%p1174_p2) target bundleno = 865 (0x361), region = 175 }
 0x365   : >> { %s1405_s8 = sshll.u32 %s2345_s1, 3  ;;  %s1747_s21 = smov %s2345_s1  }
 0x366   : >> { %s1188_s19 = scalar_lea.vmem %s1169_s16, %s1405_s8 [#allocation6]   ;;  %s1189_s9 = scalar_lea.vmem %s1171_s0, %s1405_s8  }
 0x369 PF: > { %s1201_s29 = sand.u32 1, %s1708_s24   ;;  %p2329_p3 = scmp.ge.s32.totalorder %s1720_s27, 2 }
 0x36a   : > { %s1202_s20 = scalar_lea.sflag [#allocation4], %s1201_s29 }
 0x36b   : > { %p1421_p4 = pnand %p2329_p3, %p1870_p10 }
 0x36d   : > { %p1422_p11 = pneg %p1421_p4 }
 0x36f   : > { %1703 = dma.done.wait (%p1422_p11), %s1202_s20, 256  }
 0x370   : > { %1705 = vsyncadd (%p1422_p11), %s1202_s20, 4294967040  ;;  %s2330_s26 = sld [smem:[#allocation9_spill]]  ;;  %p21_p6 = scmp.ge.s32.totalorder %s1847_s30, 4  }
 0x371   : > { %s2331_s18 = sld [smem:[#allocation10_spill]]  ;;  %s2332_s24 = smov %s1712_s25 }
 0x372   : > { %s2335_s27 = smov %s1847_s30 }
 0x373   :  { %23 = sbr.rel (!%p21_p6) target bundleno = 8 (0x8), region = 186 }
 0x376   : > { %s2333_s25 = smov %s2330_s26 }
 0x377   : > { %s2334_s26 = smov %s2331_s18 }
 0x378   :  { %1215 = vsyncpa [#allocation3], 1 }
 0x379   :  { %1217 = vsyncpa [#allocation3 + $0x1], 1 }
 0x37a   :  { %1218 = vsyncpa [#allocation4], 1 }
 0x37b   :  { %1220 = vsyncpa [#allocation4 + $0x1], 1 }

</bundles_post_ra>
